<compile_context>
chip_gen: v7x
topology: tpu7x:2x2x1
jax: 0.10.0
libtpu: 0.0.40
codegen_flags: <defaults>
</compile_context>

<pallas_src>
import math
import jax
import jax.numpy as jnp
from jax.experimental import pallas as pl
from jax.experimental.pallas import tpu as pltpu


def _round_up(x, m):
    return ((x + m - 1) // m) * m


def _cdiv(a, b):
    return -(-a // b)


def _dtype_bytes(dt):
    return jnp.dtype(dt).itemsize


def _tpu_budget():
    """Per-generation (row-tile cap, scoped-VMEM clamp).
    v5e/v6e: 128 MiB physical VMEM -> big row tiles, 96 MiB clamp.
    v7x:      64 MiB per TensorCore -> half the row-tile cap, ~28 MiB clamp."""
    vmem_cap = None
    try:
        info = pltpu.get_tpu_info()
        for attr in ("vmem_capacity_bytes", "vmem_bytes", "vmem_size_bytes"):
            v = getattr(info, attr, None)
            if isinstance(v, int) and v > 0:
                vmem_cap = v
                break
    except Exception:
        vmem_cap = None
    if vmem_cap is None:
        vmem_cap = 64 << 20            # conservative (v7x-safe) fallback
    if vmem_cap >= (100 << 20):        # v5e / v6e
        return 2048, 96 << 20
    return 1024, 28 << 20              # v7x


def siren_kernel(x_ref, w_ref, b_ref, o_ref):
    # MXU matmul (f32 accumulate) + f32 bias add + sine.
    # omega already folded into w/b at prep time -> no per-element scale here.
    z = jnp.dot(x_ref[...], w_ref[...], preferred_element_type=jnp.float32)
    o_ref[...] = jnp.sin(z + b_ref[...]).astype(o_ref.dtype)
    # TODO(synk): if a bundle dump shows the VALU slot saturated by the sin
    # range-reduction/polynomial (not matmul/DMA), compute the epilogue in bf16
    # on v6e/v7x (bf16 VALUs) and/or emit a bf16 output to halve writeback.


def prepare_siren_params(weight, bias, omega, compute_dtype=jnp.float32):
    """One-time parameter prep (call at init, NOT per forward):
      - fold the static omega into the linear params:
            sin(omega*(x@W^T + b)) == sin(x@(omega*W)^T + omega*b)
      - pre-transpose to (IN, OUT) so the kernel is a plain x @ W matmul,
      - pad OUT up to a lane-dense multiple of 128 (padded cols are 0 -> sin(0)=0),
      - store W in `compute_dtype` (bf16 halves W HBM bytes and uses the native
        MXU path -- important on v5e where f32 matmul is emulated).
        Bias stays f32 so the epilogue (bias add + sin) keeps full precision.
    Returns (w_t_padded, b_padded, out_features)."""
    OUT, IN = weight.shape
    w_t = (omega * weight.astype(jnp.float32)).T                  # (IN, OUT)
    b2 = (omega * bias.astype(jnp.float32)).reshape(1, OUT)       # (1, OUT)
    out_pad = _round_up(OUT, 128)
    if out_pad != OUT:
        w_t = jnp.pad(w_t, ((0, 0), (0, out_pad - OUT)))
        b2 = jnp.pad(b2, ((0, 0), (0, out_pad - OUT)))
    return w_t.astype(compute_dtype), b2.astype(jnp.float32), OUT


def siren_layer(x, w_t, b2, out_features=None, return_padded=False):
    """x: (B, IN); w_t: (IN, OUT_pad) pre-scaled/transposed; b2: (1, OUT_pad) f32.
    Returns (B, out_features) f32, or the padded (B_pad, OUT_pad) activation if
    return_padded=True (chain SIREN layers on the padded representation and
    slice once at the end of the network to avoid a per-layer slice copy)."""
    B, IN = x.shape
    IN_w, OUT_pad = w_t.shape
    assert IN == IN_w
    if out_features is None:
        out_features = OUT_pad

    compute_dtype = w_t.dtype
    if x.dtype != compute_dtype:
        x = x.astype(compute_dtype)
    cbytes = _dtype_bytes(compute_dtype)

    tm_cap, vmem_clamp = _tpu_budget()

    # Weight/bias resident: TN spans all of OUT_pad (capped at 1024) so the
    # W/b block index is constant across the batch grid -> DMA'd once.
    if OUT_pad <= 1024:
        TN = OUT_pad
    else:
        TN = 128
        for cand in (1024, 512, 256):
            if OUT_pad % cand == 0:
                TN = cand
                break
    n_col_tiles = OUT_pad // TN

    # Row tile: as large as the per-generation budget allows (double-buffered
    # x/out + resident W must fit), balanced across the batch so padding waste
    # is at most 7 rows.
    def _fits(tm):
        est = 2 * (tm * IN * cbytes + IN * TN * cbytes + TN * 4 + tm * TN * 4)
        return est <= vmem_clamp

    while tm_cap > 64 and not _fits(tm_cap):
        tm_cap //= 2
    n_row_tiles = max(1, _cdiv(B, tm_cap))
    TM = _round_up(_cdiv(B, n_row_tiles), 8)     # balanced, multiple of 8
    B_pad = TM * n_row_tiles
    if B_pad != B:
        x = jnp.pad(x, ((0, B_pad - B), (0, 0)))

    vmem_est = 2 * (TM * IN * cbytes + IN * TN * cbytes + TN * 4 + TM * TN * 4)
    vmem_limit = int(min(max(2 * vmem_est, 8 << 20), vmem_clamp))

    out = pl.pallas_call(
        siren_kernel,
        out_shape=jax.ShapeDtypeStruct((B_pad, OUT_pad), jnp.float32),
        grid_spec=pl.GridSpec(
            grid=(n_row_tiles, n_col_tiles),
            in_specs=[
                # TODO(synk): add pipeline_mode=pl.Buffered(3) on x if a profile
                # still shows exposed input DMA after enlarging TM (VMEM
                # headroom permitting, especially on v7x).
                pl.BlockSpec((TM, IN), lambda i, j: (i, 0)),   # x rows (streamed)
                pl.BlockSpec((IN, TN), lambda i, j: (0, j)),   # W (resident when n_col_tiles==1)
                pl.BlockSpec((1, TN), lambda i, j: (0, j)),    # bias (resident)
            ],
            out_specs=pl.BlockSpec((TM, TN), lambda i, j: (i, j)),
        ),
        compiler_params=pltpu.CompilerParams(
            # batch is the leading 'parallel' axis -> v7x's two TCs shard
            # disjoint x row-tiles and each keeps its own tiny resident W copy.
            dimension_semantics=("parallel", "parallel"),
            vmem_limit_bytes=vmem_limit,
        ),
    )(x, w_t, b2)

    if return_padded:
        return out
    return out[:B, :out_features]


def init_siren_params(key, in_features, out_features, is_first, omega):
    """Deterministic SIREN init matching the PyTorch module's __init__."""
    if is_first:
        bound = 1.0 / in_features
    else:
        bound = math.sqrt(6.0 / in_features) / omega
    kw, kb = jax.random.split(key)
    weight = jax.random.uniform(
        kw, (out_features, in_features), jnp.float32, minval=-bound, maxval=bound)
    bias = jax.random.uniform(
        kb, (out_features,), jnp.float32, minval=-bound, maxval=bound)
    return weight, bias


def _reference(x, weight, bias, omega):
    return jnp.sin(omega * (x @ weight.T + bias))


if __name__ == "__main__":
    key = jax.random.PRNGKey(0)
    omega = 30.0

    # --- test 1: small shapes, f32 path ----------------------------------
    k_x, k_p, key = jax.random.split(key, 3)
    batch, in_features, out_features = 8, 16, 32
    x = jax.random.uniform(k_x, (batch, in_features), jnp.float32,
                           minval=-1.0, maxval=1.0)
    weight, bias = init_siren_params(k_p, in_features, out_features,
                                     is_first=True, omega=omega)
    w_t, b2, out_f = prepare_siren_params(weight, bias, omega)
    out = jax.block_until_ready(siren_layer(x, w_t, b2, out_f))
    ref = _reference(x, weight, bias, omega)
    assert out.shape == (batch, out_features)
    assert jnp.allclose(out, ref, atol=1e-4, rtol=1e-4)

    # --- test 2: non-aligned shapes (padding + balanced row tiles), f32 --
    k_x2, k_p2, key = jax.random.split(key, 3)
    batch2, in2, out2 = 84, 48, 160            # B not %8, OUT not %128
    x2 = jax.random.uniform(k_x2, (batch2, in2), jnp.float32,
                            minval=-1.0, maxval=1.0)
    weight2, bias2 = init_siren_params(k_p2, in2, out2,
                                       is_first=False, omega=omega)
    w_t2, b22, out_f2 = prepare_siren_params(weight2, bias2, omega)
    out2_val = jax.block_until_ready(siren_layer(x2, w_t2, b22, out_f2))
    ref2 = _reference(x2, weight2, bias2, omega)
    assert out2_val.shape == (batch2, out2)
    assert jnp.allclose(out2_val, ref2, atol=1e-4, rtol=1e-4)

    # --- test 3: bf16 x/W storage, f32 accumulation + epilogue -----------
    # omega is folded into W before the bf16 cast, so weight quantization is
    # amplified into sin's argument -> validate with a looser tolerance.
    w_t3, b23, out_f3 = prepare_siren_params(weight2, bias2, omega,
                                             compute_dtype=jnp.bfloat16)
    out3_val = jax.block_until_ready(siren_layer(x2, w_t3, b23, out_f3))
    assert out3_val.shape == (batch2, out2)
    assert out3_val.dtype == jnp.float32
    assert jnp.allclose(out3_val, ref2, atol=5e-2, rtol=0.0)

    print("KERNEL_OK")
</pallas_src>

<mosaic_0001>
module attributes {stable_mosaic.version = 11 : i64} {
  func.func @siren_kernel(%arg0: i32, %arg1: i32, %arg2: memref<8x16xf32, #tpu.memory_space<vmem>>, %arg3: memref<16x128xf32, #tpu.memory_space<vmem>>, %arg4: memref<1x128xf32, #tpu.memory_space<vmem>>, %arg5: memref<8x128xf32, #tpu.memory_space<vmem>>) attributes {dimension_semantics = [#tpu.dimension_semantics<parallel>, #tpu.dimension_semantics<parallel>], iteration_bounds = array<i64: 1, 1>, scalar_prefetch = 0 : i64, scratch_operands = 0 : i64, tpu.core_type = #tpu.core_type<tc>, window_params = [{transform_indices = @transform_0, window_bounds = array<i64: 8, 16>}, {transform_indices = @transform_1, window_bounds = array<i64: 16, 128>}, {transform_indices = @transform_2, window_bounds = array<i64: 1, 128>}, {transform_indices = @transform_3, window_bounds = array<i64: 8, 128>}]} {
    %c0 = arith.constant 0 : index
    %c0_0 = arith.constant 0 : index
    %0 = vector.load %arg2[%c0, %c0_0] : memref<8x16xf32, #tpu.memory_space<vmem>>, vector<8x16xf32>
    %c0_1 = arith.constant 0 : index
    %c0_2 = arith.constant 0 : index
    %1 = vector.load %arg3[%c0_1, %c0_2] : memref<16x128xf32, #tpu.memory_space<vmem>>, vector<16x128xf32>
    %cst = arith.constant dense<0.000000e+00> : vector<8x128xf32>
    %2 = tpu.matmul %0, %1, %cst {dimension_numbers = #tpu.dot_dimension_numbers<[1], [0], [0], [1], [0, 0, 1, 1], [], []>} : vector<8x16xf32>, vector<16x128xf32>, vector<8x128xf32> -> vector<8x128xf32>
    %c0_3 = arith.constant 0 : index
    %c0_4 = arith.constant 0 : index
    %3 = vector.load %arg4[%c0_3, %c0_4] : memref<1x128xf32, #tpu.memory_space<vmem>>, vector<1x128xf32>
    %4 = vector.broadcast %3 : vector<1x128xf32> to vector<8x128xf32>
    %5 = arith.addf %2, %4 : vector<8x128xf32>
    %6 = math.sin %5 : vector<8x128xf32>
    %c0_5 = arith.constant 0 : index
    %c0_6 = arith.constant 0 : index
    %7 = vector.load %arg5[%c0_5, %c0_6] : memref<8x128xf32, #tpu.memory_space<vmem>>, vector<8x128xf32>
    tpu.vector_store %arg5[%c0_5, %c0_6], %6 {strides = array<i32>} : memref<8x128xf32, #tpu.memory_space<vmem>>, vector<8x128xf32>,
    return
  }
  func.func @transform_0(%arg0: i32, %arg1: i32) -> (i32, i32) {
    %c0_i32 = arith.constant 0 : i32
    %c0_i32_0 = arith.constant 0 : i32
    return %arg0, %c0_i32 : i32, i32
  }
  func.func @transform_1(%arg0: i32, %arg1: i32) -> (i32, i32) {
    %c0_i32 = arith.constant 0 : i32
    %c0_i32_0 = arith.constant 0 : i32
    return %c0_i32, %arg1 : i32, i32
  }
  func.func @transform_2(%arg0: i32, %arg1: i32) -> (i32, i32) {
    %c0_i32 = arith.constant 0 : i32
    %c0_i32_0 = arith.constant 0 : i32
    return %c0_i32, %arg1 : i32, i32
  }
  func.func @transform_3(%arg0: i32, %arg1: i32) -> (i32, i32) {
    %c0_i32 = arith.constant 0 : i32
    return %arg0, %arg1 : i32, i32
  }
}

</mosaic_0001>

<bundles_post_ra>
// kernel: tpu_custom_call.1
= control target key start
LH: loop header
LB: loop body
LE: loop exit
PB: predicated region body
PF: predicated region fallthrough
CT: control target
= control target key end

     0   :  { %8 = vsyncpa [#allocation3], 0  ;;  %s460_s0 = inlined_call_operand.hbm [shape: f32[8,16], index: 0, kind: input, shape index: {}]   ;;  %s461_s1 = inlined_call_operand.hbm [shape: f32[16,128], index: 1, kind: input, shape index: {}]   ;;  %s462_s2 = inlined_call_operand.vmem [shape: f32[1,128], index: 2, kind: input, shape index: {}]   ;;  %s463_s3 = inlined_call_operand.hbm [shape: f32[8,128], index: 3, kind: output, shape index: {}]  }
   0x1   :  { %9 = vsyncpa [#allocation6], 0 }
   0x2   :  { %10 = vsyncpa [#allocation4], 0  ;;  %s359_s12 = smov [#allocation2]   ;;  %s360_s14 = smov [#allocation5]  }
   0x3   :  { %s17_s13 = sshll.u32 %s359_s12, 4  ;;  %s26_s15 = sshll.u32 %s360_s14, 4  ;;  %s18_s13 = int_to_ptr.vmem [resolvable:$true] %s17_s13  ;;  %s393_s15 = int_to_ptr.vmem [resolvable:$true] %s26_s15 }
   0x4   :  { %s287_s18 = scalar_lea.hbm %s460_s0, 128 }
   0x5   :  { %p288_p0 = scmp.ne.s32.totalorder %s460_s0, %s287_s18  ;;  %p291_p1 = scmp.lt.u32.totalorder %s287_s18, %s460_s0 }
   0x7   :  { %p293_p2 = pnand %p291_p1, %p288_p0 }
   0x9   :  { %296 = shalt.err (!%p293_p2)
}
   0xa   :  { %s297_s23 = scalar_lea.vmem %s18_s13, 128  ;;  %p302_p4 = scmp.lt.s32.totalorder %s18_s13, %s18_s13 }
   0xb   :  { %p298_p3 = scmp.ne.s32.totalorder %s18_s13, %s297_s23  ;;  %p303_p5 = scmp.lt.s32.totalorder %s297_s23, %s297_s23 }
   0xd   :  { %p304_p6 = por %p303_p5, %p302_p4 }
   0xf   :  { %p305_p7 = pnand %p304_p6, %p298_p3 }
  0x11   :  { %308 = shalt.err (!%p305_p7)
}
  0x12   :  { %20 = dma.hbm_to_vmem [thread:$0]  %s460_s0, 128, %s18_s13, [#allocation3]  }
  0x13   :  { %s309_s28 = scalar_lea.hbm %s461_s1, 256 }
  0x14   :  { %p310_p8 = scmp.ne.s32.totalorder %s461_s1, %s309_s28  ;;  %p313_p9 = scmp.lt.u32.totalorder %s309_s28, %s461_s1 }
  0x16   :  { %p315_p10 = pnand %p313_p9, %p310_p8 }
  0x18   :  { %318 = shalt.err (!%p315_p10)
}
  0x19   :  { %s319_s6 = scalar_lea.vmem %s393_s15, 256  ;;  %p324_p12 = scmp.lt.s32.totalorder %s393_s15, %s393_s15 }
  0x1a   :  { %p320_p11 = scmp.ne.s32.totalorder %s393_s15, %s319_s6  ;;  %p325_p13 = scmp.lt.s32.totalorder %s319_s6, %s319_s6 }
  0x1c   :  { %p326_p0 = por %p325_p13, %p324_p12 }
  0x1e   :  { %p327_p1 = pnand %p326_p0, %p320_p11 }
  0x20   :  { %330 = shalt.err (!%p327_p1)
}
  0x21   :  { %s361_s0 = smov 128   ;;  %s362_s7 = smov 8  }
  0x22   :  { %32 = dma.hbm_to_vmem [thread:$0]  %s461_s1, 256, %s393_s15, [#allocation6], %s361_s0, %s361_s0, %s362_s7  }
  0x23   :  { %353 = dma.done.wait [#allocation3], 128  }
  0x24   :  { %354 = vsyncadd [#allocation3], 4294967168 }
  0x25   :  { %355 = dma.done.wait [#allocation6], 256  }
  0x26   :  { %356 = vsyncadd [#allocation6], 4294967040  ;;  %v363_v0 = vmov 0.0|0.0   ;;  %vm364_vm0 = vmmov 0   ;;  %v365_v1 = vmov 0.0   ;;  %v42_v2 = vld [vmem:[#allocation5] sm:$0xff] }
  0x27   :  { %262 = vmatprep.subr.bf16.mxu0 %v363_v0  ;;  %259 = vmatprep.mubr.msk.f32.mxu0 %vm364_vm0, %v365_v1  ;;  %v43_v3 = vld [vmem:[#allocation5 + $0x8] sm:$0xff]  ;;  %v41_v5 = vld [vmem:[#allocation2] sm:$0xff]  ;;  %vm51_vm1 = vcmask 130048   ;;  %v366_v20 = vmov 683565275   ;;  %s372_s1 = smov [#allocation7]  }
  0x28   :  { %v263_v4 = vpack.c.bf16 %v43_v3, %v42_v2  ;;  %v246_v6 = vld [vmem:[%s462_s2] ss:$0 sm:$0xff]  ;;  %v367_v22 = vmov 2475754826   ;;  %v368_v25 = vmov 2131351028  }
  0x29   :  { %v369_v28 = vmov 2102212464   ;;  %v370_v31 = vmov 920167782   ;;  %v371_v34 = vmov 1326507024  }
  0x2a   :  { %264 = vmatpush3.bf16.msra.mxu0 %v263_v4  ;;  %s236_s2 = sshll.u32 %s372_s1, 4  ;;  %s237_s2 = int_to_ptr.vmem [resolvable:$true] %s236_s2 }
  0x2b   :  { %s331_s12 = scalar_lea.vmem %s237_s2, 128  ;;  %p336_p3 = scmp.lt.s32.totalorder %s237_s2, %s237_s2 }
  0x2c   :  { %p332_p2 = scmp.ne.s32.totalorder %s237_s2, %s331_s12  ;;  %p337_p4 = scmp.lt.s32.totalorder %s331_s12, %s331_s12 }
  0x2d   :  { %260 = vmatmul.mubr.msk.f32.vlgmr.msra.gmra.mrb[0].mxu0 %vm51_vm1, %v41_v5 }
  0x2e   :  { %p338_p5 = por %p337_p4, %p336_p3 }
  0x30   :  { %p339_p6 = pnand %p338_p5, %p332_p2 }
 0x100   :  { %v121_v7 = vpop.f32.mrb[0].mxu0 }
 0x101   :  { %v427_v8 = vadd.f32 %v246_v6, %v121_v7  ;;  %v261_v9 = vpop.f32.mrb[1].mxu0 }
 0x103   :  { %v128_v10 = vand.u32 2139095040, %v427_v8  ;;  %v125_v14 = vand.u32 2147483647, %v427_v8  ;;  %vm127_vm9 = vcmp.lt.s32.totalorder %v427_v8, 0  ;;  %vm217_vm14 = vweird.f32 %v427_v8 }
 0x105   :  { %v129_v11 = vshrl.u32 %v128_v10, 23  ;;  %v132_v17 = vand.u32 8388607, %v125_v14  ;;  %vm126_vm10 = vcmp.le.f32.partialorder %v125_v14, 0.7853982 }
 0x107   :  { %v248_v12 = vadd.s32 4294967169, %v129_v11  ;;  %v133_v36 = vor.u32 8388608, %v132_v17 }
 0x109   :  { %v135_v13 = vadd.s32 1, %v248_v12  ;;  %v173_v50 = vshll.u32 %v133_v36, 8 }
 0x10b   :  { %vm136_vm2 = vcmp.gt.s32.totalorder %v135_v13, 0 }
 0x10c   :  { %v137_v15 = vsel %vm136_vm2, %v135_v13, 0 }
 0x10d   :  { %v139_v16 = vand.u32 31, %v137_v15  ;;  %v138_v19 = vshrl.u32 %v137_v15, 5 }
 0x10f   :  { %v140_v18 = vsub.s32 32, %v139_v16  ;;  %v142_v21 = vshll.u32 %v366_v20, %v139_v16  ;;  %v145_v23 = vshll.u32 %v367_v22, %v139_v16  ;;  %v148_v27 = vshll.u32 %v368_v25, %v139_v16 }
 0x110   :  { %v151_v30 = vshll.u32 %v369_v28, %v139_v16  ;;  %v154_v33 = vshll.u32 %v370_v31, %v139_v16  ;;  %vm157_vm3 = vcmp.lt.s32.totalorder %v138_v19, 1  ;;  %vm160_vm4 = vcmp.lt.s32.totalorder %v138_v19, 4 }
 0x111   :  { %v143_v24 = vshrl.u32 %v367_v22, %v140_v18  ;;  %v146_v26 = vshrl.u32 %v368_v25, %v140_v18  ;;  %v149_v29 = vshrl.u32 %v369_v28, %v140_v18  ;;  %v152_v32 = vshrl.u32 %v370_v31, %v140_v18 }
 0x112   :  { %v155_v35 = vshrl.u32 %v371_v34, %v140_v18  ;;  %v141_v45 = vshrl.u32 %v366_v20, %v140_v18  ;;  %vm159_vm5 = vcmp.lt.s32.totalorder %v138_v19, 3  ;;  %vm158_vm6 = vcmp.lt.s32.totalorder %v138_v19, 2 }
 0x113   :  { %v144_v37 = vor.u32 %v143_v24, %v142_v21  ;;  %v147_v38 = vor.u32 %v146_v26, %v145_v23  ;;  %v150_v39 = vor.u32 %v149_v29, %v148_v27  ;;  %v153_v40 = vor.u32 %v152_v32, %v151_v30 }
 0x114   :  { %v156_v41 = vor.u32 %v155_v35, %v154_v33 }
 0x115   :  { %v162_v42 = vsel %vm160_vm4, %v150_v39, 2102212464  ;;  %v165_v43 = vsel %vm157_vm3, %v144_v37, %v147_v38  ;;  %v169_v44 = vsel %vm157_vm3, %v147_v38, %v150_v39  ;;  %v166_v46 = vsel %vm160_vm4, %v153_v40, 920167782 }
 0x116   :  { %v170_v47 = vsel %vm160_vm4, %v156_v41, 1326507024  ;;  %v167_v48 = vsel %vm159_vm5, %v150_v39, %v166_v46  ;;  %v161_v51 = vsel %vm157_vm3, %v141_v45, %v144_v37  ;;  %v163_v52 = vsel %vm159_vm5, %v147_v38, %v162_v42 }
 0x117   :  { %v171_v49 = vsel %vm159_vm5, %v153_v40, %v170_v47  ;;  %v168_v53 = vsel %vm158_vm6, %v165_v43, %v167_v48  ;;  %v164_v59 = vsel %vm158_vm6, %v161_v51, %v163_v52 }
 0x118   :  { %v172_v54 = vsel %vm158_vm6, %v169_v44, %v171_v49  ;;  %v436_v57 = vmul.u32.u64.low %v173_v50, %v168_v53  ;;  %v437_v58 = vmul.u32.u64.high %v173_v50, %v168_v53, %v436_v57  ;;  %v180_v61 = vmul.u32 %v173_v50, %v164_v59 }
 0x119   :  { %v433_v55 = vmul.u32.u64.low %v173_v50, %v172_v54  ;;  %v434_v56 = vmul.u32.u64.high %v173_v50, %v172_v54, %v433_v55 }
 0x11a   :  { %v183_v60 = vadd.s32 1, %v437_v58 }
 0x11b   :  { %vm182_vm7 = vc.u32 %v434_v56, %v436_v57  ;;  %v181_v10 = vadd.s32 %v436_v57, %v434_v56 }
 0x11c   :  { %v184_v62 = vsel %vm182_vm7, %v183_v60, %v437_v58 }
 0x11d   :  { %v185_v63 = vadd.s32 %v184_v62, %v180_v61 }
 0x11f   :  { %v186_v0 = vadd.s32 536870912, %v185_v63 }
 0x121   :  { %v187_v1 = vshrl.u32 %v186_v0, 30 }
 0x123   :  { %v188_v2 = vshll.u32 %v187_v1, 30  ;;  %v211_v23 = vsub.s32 4, %v187_v1 }
 0x125   :  { %v189_v3 = vsub.s32 %v185_v63, %v188_v2  ;;  %v212_v26 = vsel %vm127_vm9, %v211_v23, %v187_v1 }
 0x126   :  { %v214_v28 = vsel %vm126_vm10, 0, %v212_v26 }
 0x127   :  { %v191_v4 = vsub.s32 0, %v189_v3  ;;  %v218_v29 = vadd.s32 3, %v214_v28 }
 0x129   :  { %v249_v5 = vmin.u32 %v191_v4, %v189_v3  ;;  %v219_v30 = vand.u32 3, %v218_v29 }
 0x12b   :  { %v193_v6 = vclz %v249_v5  ;;  %vm224_vm11 = vcmp.eq.s32.totalorder %v219_v30, 2  ;;  %vm221_vm12 = vcmp.eq.s32.totalorder %v219_v30, 0  ;;  %vm220_vm13 = vcmp.lt.s32.totalorder %v219_v30, 2 }
 0x12d   :  { %v250_v7 = vadd.s32 4294967294, %v193_v6 }
 0x12f   :  { %vm251_vm8 = vcmp.lt.s32.totalorder %v250_v7, 0 }
 0x130   :  { %v196_v9 = vsel %vm251_vm8, 0, %v250_v7 }
 0x131   :  { %v197_v11 = vsub.s32 32, %v196_v9  ;;  %v201_v12 = vsub.s32 4294967266, %v196_v9  ;;  %v198_v13 = vshll.u32 %v189_v3, %v196_v9 }
 0x133   :  { %v199_v15 = vshrl.u32 %v181_v10, %v197_v11  ;;  %v202_v16 = vadd.s32 127, %v201_v12 }
 0x135   :  { %v200_v17 = vor.u32 %v199_v15, %v198_v13  ;;  %v203_v18 = vshll.u32 %v202_v16, 23 }
 0x137   :  { %v204_v19 = vor.u32 4788187, %v203_v18  ;;  %v207_v21 = vcvt.s32.f32 %v200_v17 }
 0x139   :  { %v205_v20 = vand.u32 2147483647, %v204_v19 }
 0x13b   :  { %v208_v22 = vmul.f32 %v207_v21, %v205_v20 }
 0x13d   :  { %v209_v24 = vxor.u32 2147483648, %v208_v22 }
 0x13f   :  { %v210_v25 = vsel %vm127_vm9, %v209_v24, %v208_v22 }
 0x140   :  { %v213_v27 = vsel %vm126_vm10, %v427_v8, %v210_v25 }
 0x141   :  { %283 = vcosq.f32 %v213_v27 }
 0x142   :  { %285 = vsinq.f32 %v213_v27 }
 0x14b   :  { %v284_v31 = vpop.eup %283 }
 0x14c   :  { %v286_v32 = vpop.eup %285  ;;  %v225_v33 = vxor.u32 2147483648, %v284_v31 }
 0x14d   :  { %v222_v34 = vxor.u32 2147483648, %v286_v32 }
 0x14e   :  { %v226_v35 = vsel %vm224_vm11, %v225_v33, %v286_v32 }
 0x14f   :  { %v223_v36 = vsel %vm221_vm12, %v284_v31, %v222_v34 }
 0x150   :  { %v227_v14 = vsel %vm220_vm13, %v223_v36, %v226_v35 }
 0x151   :  { %v228_v37 = vsel %vm217_vm14, nan, %v227_v14 }
 0x152   :  { %229 = vst [vmem:[#allocation7] sm:$0xff] %v228_v37 }
 0x153   :  { %342 = shalt.err (!%p339_p6)
}
 0x154   :  { %s343_s15 = scalar_lea.hbm %s463_s3, 128 }
 0x155   :  { %p344_p7 = scmp.ne.s32.totalorder %s463_s3, %s343_s15  ;;  %p347_p8 = scmp.lt.u32.totalorder %s343_s15, %s463_s3 }
 0x157   :  { %p349_p9 = pnand %p347_p8, %p344_p7 }
 0x159   :  { %352 = shalt.err (!%p349_p9)
}
 0x15a   :  { %239 = dma.vmem_to_hbm [thread:$0]  %s237_s2, 128, %s463_s3, [#allocation4]  }
 0x15b   :  { %357 = dma.done.wait [#allocation4], 128  }
 0x15c   :  { %358 = vsyncadd [#allocation4], 4294967168 }
 0x15d   :  { %243 = vsyncpa [#allocation3], 1 }
 0x15e   :  { %244 = vsyncpa [#allocation6], 1 }
 0x15f   :  { %245 = vsyncpa [#allocation4], 1 }

</bundles_post_ra>
